<compile_context>
chip_gen: v7x
topology: tpu7x:2x2x1
jax: 0.10.0
libtpu: 0.0.40
codegen_flags: <defaults>
</compile_context>

<pallas_src>
import numpy as np
import jax
import jax.numpy as jnp
from jax import lax
from jax.experimental import pallas as pl
from jax.experimental.pallas import tpu as pltpu

# ---------------- config (small, consistent with the module) ----------------
B = 2          # batch
NFIELD = 4     # F
NFEAT = 100    # vocabulary size
NEMB = 8       # E  (== one f32 sublane group)
MLP_HID = 32   # mlp hidden width (mlp_layers = 2)
NPAIR = NFIELD * (NFIELD - 1) // 2       # K = 6
NINPUT = NFIELD * NEMB                   # 32
KE = NPAIR * NEMB                        # 48
NFEAT_PAD = 128                          # emb table padded to one lane group
TB_MAX = 1024                            # VMEM-safe across v5e/v6e/v7x

_VI_F, _VJ_F = (list(int(v) for v in a) for a in np.triu_indices(NFIELD, k=1))


def _choose_tb(batch):
    """Batch tile: big enough to amortize the ~0.35us per-step cost, at least
    two tiles when the batch allows (v7x megacore), capped for VMEM safety."""
    half = (batch + 1) // 2
    tb = ((half + 127) // 128) * 128
    return int(min(TB_MAX, max(128, tb)))


# ---------------------------- Pallas kernel ----------------------------
def _kpnn_kernel(ids_ref, vals_ref, emb_ref, kb_ref, w1x_ref, w1p_ref,
                 w2_ref, ws_ref, out_ref):
    tb = ids_ref.shape[1]
    ids = ids_ref[...]                    # (F, TB) int32, batch on lanes
    vals = vals_ref[...]                  # (F, TB) f32
    emb_t = emb_ref[...]                  # (E, NFEAT_PAD)  resident
    kb = kb_ref[...]                      # (KE, KE)        block-diag kernel
    w1x = w1x_ref[...]                    # (H, NINPUT)     W1[:NINPUT].T
    w1p = w1p_ref[...]                    # (H, KE)         expanded W1 pair part
    w2t = w2_ref[...]                     # (H, H)
    ws = ws_ref[...]                      # (H, 8): b1 | b2 | w3 | b3 | 0...

    # --- embedding gather in-kernel: one-hot (iota == id) scaled by value,
    #     then one tiny MXU push per field (4 x (8,128)x(128,TB)).
    iota = lax.broadcasted_iota(jnp.int32, (NFEAT_PAD, tb), 0)
    fields = []
    for f in range(NFIELD):
        oh = jnp.where(iota == ids[f:f + 1, :], vals[f:f + 1, :], 0.0)  # (128,TB)
        fields.append(jnp.dot(emb_t, oh,
                              preferred_element_type=jnp.float32))      # (E, TB)
    x = jnp.concatenate(fields, axis=0)                                  # (NINPUT,TB)

    # --- kernel product: pair gather via aligned sublane-group slices, ONE
    #     lane-dense MXU pass against the block-diagonal kernel, VPU multiply.
    vi = jnp.concatenate([x[f * NEMB:(f + 1) * NEMB, :] for f in _VI_F], axis=0)
    vj = jnp.concatenate([x[f * NEMB:(f + 1) * NEMB, :] for f in _VJ_F], axis=0)
    t = jnp.dot(kb, vi, preferred_element_type=jnp.float32)              # (KE,TB)
    tv = t * vj                                                           # (KE,TB)

    # --- MLP.  concat([x_flat, prod]) @ W1 == W1x @ x + W1p_expanded @ tv,
    #     where the per-pair sum over the 8 embedding rows is absorbed into
    #     the expanded pair weights (no (D,TB) concat copy, no sublane shifts).
    b1 = ws[:, 0:1]
    b2 = ws[:, 1:2]
    w3 = ws[:, 2:3]
    b3 = ws[0:1, 3:4]
    h = (jnp.dot(w1x, x, preferred_element_type=jnp.float32)
         + jnp.dot(w1p, tv, preferred_element_type=jnp.float32) + b1)
    h = jnp.maximum(h, 0.0)
    h = jnp.maximum(jnp.dot(w2t, h, preferred_element_type=jnp.float32) + b2, 0.0)
    # Final (H,1) projection as VPU multiply + sublane reduce (lane-dense (1,TB)).
    out_ref[...] = jnp.sum(h * w3, axis=0, keepdims=True) + b3


# ---------------------------- packing + wrapper ----------------------------
def pack_params(params):
    """One-time repack of the module parameters into TPU-friendly slabs."""
    # Embedding table, transposed and lane-padded: (E, 128).
    emb_t = jnp.zeros((NEMB, NFEAT_PAD), jnp.float32).at[:, :NFEAT].set(
        params["emb"].T)

    # Block-diagonal pair kernel: block k = kernel[:, k, :].T  -> (KE, KE).
    kernel = params["kernel"]                                   # (E, K, E)
    kb = jnp.zeros((KE, KE), jnp.float32)
    for k in range(NPAIR):
        kb = kb.at[k * NEMB:(k + 1) * NEMB,
                   k * NEMB:(k + 1) * NEMB].set(kernel[:, k, :].T)

    w1 = params["w1"]                                           # (D_IN, H)
    w1x_t = jnp.asarray(w1[:NINPUT, :].T, jnp.float32)          # (H, NINPUT)
    # Expanded pair weights: w1p_t[h, k*E + j] = w1[NINPUT + k, h]  (absorbs the
    # per-pair sum over j into the matmul).
    w1p_t = jnp.asarray(jnp.repeat(w1[NINPUT:, :].T, NEMB, axis=1), jnp.float32)
    w2_t = jnp.asarray(params["w2"].T, jnp.float32)             # (H, H)

    ws = jnp.zeros((MLP_HID, 8), jnp.float32)
    ws = ws.at[:, 0].set(params["b1"][0])
    ws = ws.at[:, 1].set(params["b2"][0])
    ws = ws.at[:, 2].set(params["w3"][:, 0])
    ws = ws.at[:, 3].set(params["b3"][0, 0])
    return dict(emb_t=emb_t, kb=kb, w1x_t=w1x_t, w1p_t=w1p_t, w2_t=w2_t, ws=ws)


def kpnn_forward(ids, values, packed):
    """ids: int32 (B,F); values: float32 (B,F) -> float32 (B,)"""
    b, f = ids.shape
    assert f == NFIELD and f * NEMB == NINPUT and NFEAT <= NFEAT_PAD

    tb = _choose_tb(b)
    nt = pl.cdiv(b, tb)
    bp = nt * tb

    # Only ids/values stream through HBM (tiny, ~32 B/row); the gather happens
    # inside the kernel.  Feature-major, batch padded to the lane-tile width.
    ids_t = jnp.zeros((f, bp), jnp.int32).at[:, :b].set(ids.T)
    vals_t = jnp.zeros((f, bp), jnp.float32).at[:, :b].set(values.T)

    y = pl.pallas_call(
        _kpnn_kernel,
        out_shape=jax.ShapeDtypeStruct((1, bp), jnp.float32),
        grid=(nt,),
        in_specs=[
            pl.BlockSpec((f, tb), lambda i: (0, i)),                 # ids tile
            pl.BlockSpec((f, tb), lambda i: (0, i)),                 # values tile
            pl.BlockSpec((NEMB, NFEAT_PAD), lambda i: (0, 0)),       # emb (resident)
            pl.BlockSpec((KE, KE), lambda i: (0, 0)),                # kernel (resident)
            pl.BlockSpec((MLP_HID, NINPUT), lambda i: (0, 0)),       # W1x^T
            pl.BlockSpec((MLP_HID, KE), lambda i: (0, 0)),           # W1pair^T (expanded)
            pl.BlockSpec((MLP_HID, MLP_HID), lambda i: (0, 0)),      # W2^T
            pl.BlockSpec((MLP_HID, 8), lambda i: (0, 0)),            # b1|b2|w3|b3
        ],
        out_specs=pl.BlockSpec((1, tb), lambda i: (0, i)),           # lane-dense out
        compiler_params=pltpu.CompilerParams(
            dimension_semantics=("parallel",)),                      # megacore on v7x
    )(ids_t, vals_t, packed["emb_t"], packed["kb"], packed["w1x_t"],
      packed["w1p_t"], packed["w2_t"], packed["ws"])
    return y[0, :b]                                                  # .squeeze(1)


kpnn_forward_jit = jax.jit(kpnn_forward)


# ---------------------------- reference (pure JAX) ----------------------------
def kpnn_reference(ids, values, params):
    x_emb = params["emb"][ids] * values[..., None]
    vi_idx, vj_idx = np.triu_indices(ids.shape[1], k=1)
    vi, vj = x_emb[:, vi_idx, :], x_emb[:, vj_idx, :]
    prod = jnp.einsum('bki,ikj,bkj->bk', vi, params["kernel"], vj)
    h = jnp.concatenate([x_emb.reshape(ids.shape[0], -1), prod], axis=1)
    h = jax.nn.relu(h @ params["w1"] + params["b1"])
    h = jax.nn.relu(h @ params["w2"] + params["b2"])
    y = h @ params["w3"] + params["b3"]
    return y[:, 0]


# ---------------------------- param init ----------------------------
def _xavier_uniform(key, shape, fan_in, fan_out):
    bound = float(np.sqrt(6.0 / (fan_in + fan_out)))
    return jax.random.uniform(key, shape, jnp.float32, -bound, bound)


def _linear_init(key, fan_in, fan_out):
    kw, kb = jax.random.split(key)
    bound = float(1.0 / np.sqrt(fan_in))
    w = jax.random.uniform(kw, (fan_in, fan_out), jnp.float32, -bound, bound)
    b = jax.random.uniform(kb, (1, fan_out), jnp.float32, -bound, bound)
    return w, b


def make_params(key):
    k_emb, k_kern, k_w1, k_w2, k_w3 = jax.random.split(key, 5)
    emb = _xavier_uniform(k_emb, (NFEAT, NEMB), NFEAT, NEMB)
    kernel = _xavier_uniform(k_kern, (NEMB, NPAIR, NEMB),
                             NPAIR * NEMB, NEMB * NEMB)
    d_in = NINPUT + NPAIR
    w1, b1 = _linear_init(k_w1, d_in, MLP_HID)
    w2, b2 = _linear_init(k_w2, MLP_HID, MLP_HID)
    w3, b3 = _linear_init(k_w3, MLP_HID, 1)
    return dict(emb=emb, kernel=kernel, w1=w1, b1=b1, w2=w2, b2=b2, w3=w3, b3=b3)


if __name__ == "__main__":
    key = jax.random.PRNGKey(0)
    k_params, k_id, k_val = jax.random.split(key, 3)
    params = make_params(k_params)
    packed = pack_params(params)          # one-time weight repack

    ids = jax.random.randint(k_id, (B, NFIELD), 0, NFEAT, dtype=jnp.int32)
    values = jax.random.uniform(k_val, (B, NFIELD), jnp.float32)

    y = kpnn_forward_jit(ids, values, packed)
    y = jax.block_until_ready(y)

    y_ref = jax.block_until_ready(kpnn_reference(ids, values, params))
    np.testing.assert_allclose(np.asarray(y), np.asarray(y_ref),
                               rtol=5e-2, atol=5e-3)
    print("KERNEL_OK")
</pallas_src>

<mosaic_0001>
module attributes {stable_mosaic.version = 11 : i64} {
  func.func @_kpnn_kernel(%arg0: i32, %arg1: memref<4x128xi32, #tpu.memory_space<vmem>>, %arg2: memref<4x128xf32, #tpu.memory_space<vmem>>, %arg3: memref<8x128xf32, #tpu.memory_space<vmem>>, %arg4: memref<48x48xf32, #tpu.memory_space<vmem>>, %arg5: memref<32x32xf32, #tpu.memory_space<vmem>>, %arg6: memref<32x48xf32, #tpu.memory_space<vmem>>, %arg7: memref<32x32xf32, #tpu.memory_space<vmem>>, %arg8: memref<32x8xf32, #tpu.memory_space<vmem>>, %arg9: memref<1x128xf32, #tpu.memory_space<vmem>>) attributes {dimension_semantics = [#tpu.dimension_semantics<parallel>], iteration_bounds = array<i64: 1>, scalar_prefetch = 0 : i64, scratch_operands = 0 : i64, tpu.core_type = #tpu.core_type<tc>, window_params = [{transform_indices = @transform_0, window_bounds = array<i64: 4, 128>}, {transform_indices = @transform_1, window_bounds = array<i64: 4, 128>}, {pipeline_mode = #tpu.pipeline_mode<synchronous>, transform_indices = @transform_2, window_bounds = array<i64: 8, 128>}, {pipeline_mode = #tpu.pipeline_mode<synchronous>, transform_indices = @transform_3, window_bounds = array<i64: 48, 48>}, {pipeline_mode = #tpu.pipeline_mode<synchronous>, transform_indices = @transform_4, window_bounds = array<i64: 32, 32>}, {pipeline_mode = #tpu.pipeline_mode<synchronous>, transform_indices = @transform_5, window_bounds = array<i64: 32, 48>}, {pipeline_mode = #tpu.pipeline_mode<synchronous>, transform_indices = @transform_6, window_bounds = array<i64: 32, 32>}, {pipeline_mode = #tpu.pipeline_mode<synchronous>, transform_indices = @transform_7, window_bounds = array<i64: 32, 8>}, {transform_indices = @transform_8, window_bounds = array<i64: 1, 128>}]} {
    %c0 = arith.constant 0 : index
    %c0_0 = arith.constant 0 : index
    %0 = vector.load %arg1[%c0, %c0_0] : memref<4x128xi32, #tpu.memory_space<vmem>>, vector<4x128xi32>
    %c0_1 = arith.constant 0 : index
    %c0_2 = arith.constant 0 : index
    %1 = vector.load %arg2[%c0_1, %c0_2] : memref<4x128xf32, #tpu.memory_space<vmem>>, vector<4x128xf32>
    %c0_3 = arith.constant 0 : index
    %c0_4 = arith.constant 0 : index
    %2 = vector.load %arg3[%c0_3, %c0_4] : memref<8x128xf32, #tpu.memory_space<vmem>>, vector<8x128xf32>
    %c0_5 = arith.constant 0 : index
    %c0_6 = arith.constant 0 : index
    %3 = vector.load %arg4[%c0_5, %c0_6] : memref<48x48xf32, #tpu.memory_space<vmem>>, vector<48x48xf32>
    %c0_7 = arith.constant 0 : index
    %c0_8 = arith.constant 0 : index
    %4 = vector.load %arg5[%c0_7, %c0_8] : memref<32x32xf32, #tpu.memory_space<vmem>>, vector<32x32xf32>
    %c0_9 = arith.constant 0 : index
    %c0_10 = arith.constant 0 : index
    %5 = vector.load %arg6[%c0_9, %c0_10] : memref<32x48xf32, #tpu.memory_space<vmem>>, vector<32x48xf32>
    %c0_11 = arith.constant 0 : index
    %c0_12 = arith.constant 0 : index
    %6 = vector.load %arg7[%c0_11, %c0_12] : memref<32x32xf32, #tpu.memory_space<vmem>>, vector<32x32xf32>
    %c0_13 = arith.constant 0 : index
    %c0_14 = arith.constant 0 : index
    %7 = vector.load %arg8[%c0_13, %c0_14] : memref<32x8xf32, #tpu.memory_space<vmem>>, vector<32x8xf32>
    %8 = tpu.iota {dimensions = array<i32: 0>} : vector<128x128xi32>
    %9 = vector.extract_strided_slice %0 {offsets = [0, 0], sizes = [1, 128], strides = [1, 1]} : vector<4x128xi32> to vector<1x128xi32>
    %10 = vector.broadcast %9 : vector<1x128xi32> to vector<128x128xi32>
    %11 = arith.cmpi eq, %8, %10 : vector<128x128xi32>
    %12 = vector.extract_strided_slice %1 {offsets = [0, 0], sizes = [1, 128], strides = [1, 1]} : vector<4x128xf32> to vector<1x128xf32>
    %cst = arith.constant 0.000000e+00 : f32
    %13 = vector.shape_cast %12 : vector<1x128xf32> to vector<1x128xf32>
    %14 = vector.broadcast %13 : vector<1x128xf32> to vector<128x128xf32>
    %15 = vector.broadcast %cst : f32 to vector<128x128xf32>
    %16 = arith.select %11, %14, %15 : vector<128x128xi1>, vector<128x128xf32>
    %cst_15 = arith.constant dense<0.000000e+00> : vector<8x128xf32>
    %17 = tpu.matmul %2, %16, %cst_15 {dimension_numbers = #tpu.dot_dimension_numbers<[1], [0], [0], [1], [0, 0, 1, 1], [], []>} : vector<8x128xf32>, vector<128x128xf32>, vector<8x128xf32> -> vector<8x128xf32>
    %18 = vector.extract_strided_slice %0 {offsets = [1, 0], sizes = [1, 128], strides = [1, 1]} : vector<4x128xi32> to vector<1x128xi32>
    %19 = vector.broadcast %18 : vector<1x128xi32> to vector<128x128xi32>
    %20 = arith.cmpi eq, %8, %19 : vector<128x128xi32>
    %21 = vector.extract_strided_slice %1 {offsets = [1, 0], sizes = [1, 128], strides = [1, 1]} : vector<4x128xf32> to vector<1x128xf32>
    %cst_16 = arith.constant 0.000000e+00 : f32
    %22 = vector.shape_cast %21 : vector<1x128xf32> to vector<1x128xf32>
    %23 = vector.broadcast %22 : vector<1x128xf32> to vector<128x128xf32>
    %24 = vector.broadcast %cst_16 : f32 to vector<128x128xf32>
    %25 = arith.select %20, %23, %24 : vector<128x128xi1>, vector<128x128xf32>
    %cst_17 = arith.constant dense<0.000000e+00> : vector<8x128xf32>
    %26 = tpu.matmul %2, %25, %cst_17 {dimension_numbers = #tpu.dot_dimension_numbers<[1], [0], [0], [1], [0, 0, 1, 1], [], []>} : vector<8x128xf32>, vector<128x128xf32>, vector<8x128xf32> -> vector<8x128xf32>
    %27 = vector.extract_strided_slice %0 {offsets = [2, 0], sizes = [1, 128], strides = [1, 1]} : vector<4x128xi32> to vector<1x128xi32>
    %28 = vector.broadcast %27 : vector<1x128xi32> to vector<128x128xi32>
    %29 = arith.cmpi eq, %8, %28 : vector<128x128xi32>
    %30 = vector.extract_strided_slice %1 {offsets = [2, 0], sizes = [1, 128], strides = [1, 1]} : vector<4x128xf32> to vector<1x128xf32>
    %cst_18 = arith.constant 0.000000e+00 : f32
    %31 = vector.shape_cast %30 : vector<1x128xf32> to vector<1x128xf32>
    %32 = vector.broadcast %31 : vector<1x128xf32> to vector<128x128xf32>
    %33 = vector.broadcast %cst_18 : f32 to vector<128x128xf32>
    %34 = arith.select %29, %32, %33 : vector<128x128xi1>, vector<128x128xf32>
    %cst_19 = arith.constant dense<0.000000e+00> : vector<8x128xf32>
    %35 = tpu.matmul %2, %34, %cst_19 {dimension_numbers = #tpu.dot_dimension_numbers<[1], [0], [0], [1], [0, 0, 1, 1], [], []>} : vector<8x128xf32>, vector<128x128xf32>, vector<8x128xf32> -> vector<8x128xf32>
    %36 = vector.extract_strided_slice %0 {offsets = [3, 0], sizes = [1, 128], strides = [1, 1]} : vector<4x128xi32> to vector<1x128xi32>
    %37 = vector.broadcast %36 : vector<1x128xi32> to vector<128x128xi32>
    %38 = arith.cmpi eq, %8, %37 : vector<128x128xi32>
    %39 = vector.extract_strided_slice %1 {offsets = [3, 0], sizes = [1, 128], strides = [1, 1]} : vector<4x128xf32> to vector<1x128xf32>
    %cst_20 = arith.constant 0.000000e+00 : f32
    %40 = vector.shape_cast %39 : vector<1x128xf32> to vector<1x128xf32>
    %41 = vector.broadcast %40 : vector<1x128xf32> to vector<128x128xf32>
    %42 = vector.broadcast %cst_20 : f32 to vector<128x128xf32>
    %43 = arith.select %38, %41, %42 : vector<128x128xi1>, vector<128x128xf32>
    %cst_21 = arith.constant dense<0.000000e+00> : vector<8x128xf32>
    %44 = tpu.matmul %2, %43, %cst_21 {dimension_numbers = #tpu.dot_dimension_numbers<[1], [0], [0], [1], [0, 0, 1, 1], [], []>} : vector<8x128xf32>, vector<128x128xf32>, vector<8x128xf32> -> vector<8x128xf32>
    %45 = tpu.concatenate %17, %26, %35, %44 in 0 : vector<8x128xf32>, vector<8x128xf32>, vector<8x128xf32>, vector<8x128xf32> -> vector<32x128xf32>
    %46 = vector.extract_strided_slice %45 {offsets = [0, 0], sizes = [8, 128], strides = [1, 1]} : vector<32x128xf32> to vector<8x128xf32>
    %47 = vector.extract_strided_slice %45 {offsets = [0, 0], sizes = [8, 128], strides = [1, 1]} : vector<32x128xf32> to vector<8x128xf32>
    %48 = vector.extract_strided_slice %45 {offsets = [0, 0], sizes = [8, 128], strides = [1, 1]} : vector<32x128xf32> to vector<8x128xf32>
    %49 = vector.extract_strided_slice %45 {offsets = [8, 0], sizes = [8, 128], strides = [1, 1]} : vector<32x128xf32> to vector<8x128xf32>
    %50 = vector.extract_strided_slice %45 {offsets = [8, 0], sizes = [8, 128], strides = [1, 1]} : vector<32x128xf32> to vector<8x128xf32>
    %51 = vector.extract_strided_slice %45 {offsets = [16, 0], sizes = [8, 128], strides = [1, 1]} : vector<32x128xf32> to vector<8x128xf32>
    %52 = tpu.concatenate %46, %47, %48, %49, %50, %51 in 0 : vector<8x128xf32>, vector<8x128xf32>, vector<8x128xf32>, vector<8x128xf32>, vector<8x128xf32>, vector<8x128xf32> -> vector<48x128xf32>
    %53 = vector.extract_strided_slice %45 {offsets = [8, 0], sizes = [8, 128], strides = [1, 1]} : vector<32x128xf32> to vector<8x128xf32>
    %54 = vector.extract_strided_slice %45 {offsets = [16, 0], sizes = [8, 128], strides = [1, 1]} : vector<32x128xf32> to vector<8x128xf32>
    %55 = vector.extract_strided_slice %45 {offsets = [24, 0], sizes = [8, 128], strides = [1, 1]} : vector<32x128xf32> to vector<8x128xf32>
    %56 = vector.extract_strided_slice %45 {offsets = [16, 0], sizes = [8, 128], strides = [1, 1]} : vector<32x128xf32> to vector<8x128xf32>
    %57 = vector.extract_strided_slice %45 {offsets = [24, 0], sizes = [8, 128], strides = [1, 1]} : vector<32x128xf32> to vector<8x128xf32>
    %58 = vector.extract_strided_slice %45 {offsets = [24, 0], sizes = [8, 128], strides = [1, 1]} : vector<32x128xf32> to vector<8x128xf32>
    %59 = tpu.concatenate %53, %54, %55, %56, %57, %58 in 0 : vector<8x128xf32>, vector<8x128xf32>, vector<8x128xf32>, vector<8x128xf32>, vector<8x128xf32>, vector<8x128xf32> -> vector<48x128xf32>
    %cst_22 = arith.constant dense<0.000000e+00> : vector<48x128xf32>
    %60 = tpu.matmul %3, %52, %cst_22 {dimension_numbers = #tpu.dot_dimension_numbers<[1], [0], [0], [1], [0, 0, 1, 1], [], []>} : vector<48x48xf32>, vector<48x128xf32>, vector<48x128xf32> -> vector<48x128xf32>
    %61 = arith.mulf %60, %59 : vector<48x128xf32>
    %62 = vector.extract_strided_slice %7 {offsets = [0, 0], sizes = [32, 1], strides = [1, 1]} : vector<32x8xf32> to vector<32x1xf32>
    %63 = vector.extract_strided_slice %7 {offsets = [0, 1], sizes = [32, 1], strides = [1, 1]} : vector<32x8xf32> to vector<32x1xf32>
    %64 = vector.extract_strided_slice %7 {offsets = [0, 2], sizes = [32, 1], strides = [1, 1]} : vector<32x8xf32> to vector<32x1xf32>
    %65 = vector.extract_strided_slice %7 {offsets = [0, 3], sizes = [1, 1], strides = [1, 1]} : vector<32x8xf32> to vector<1x1xf32>
    %cst_23 = arith.constant dense<0.000000e+00> : vector<32x128xf32>
    %66 = tpu.matmul %4, %45, %cst_23 {dimension_numbers = #tpu.dot_dimension_numbers<[1], [0], [0], [1], [0, 0, 1, 1], [], []>} : vector<32x32xf32>, vector<32x128xf32>, vector<32x128xf32> -> vector<32x128xf32>
    %cst_24 = arith.constant dense<0.000000e+00> : vector<32x128xf32>
    %67 = tpu.matmul %5, %61, %cst_24 {dimension_numbers = #tpu.dot_dimension_numbers<[1], [0], [0], [1], [0, 0, 1, 1], [], []>} : vector<32x48xf32>, vector<48x128xf32>, vector<32x128xf32> -> vector<32x128xf32>
    %68 = arith.addf %66, %67 : vector<32x128xf32>
    %69 = vector.broadcast %62 : vector<32x1xf32> to vector<32x128xf32>
    %70 = arith.addf %68, %69 : vector<32x128xf32>
    %cst_25 = arith.constant 0.000000e+00 : f32
    %71 = vector.broadcast %cst_25 : f32 to vector<32x128xf32>
    %72 = arith.maximumf %70, %71 : vector<32x128xf32>
    %cst_26 = arith.constant dense<0.000000e+00> : vector<32x128xf32>
    %73 = tpu.matmul %6, %72, %cst_26 {dimension_numbers = #tpu.dot_dimension_numbers<[1], [0], [0], [1], [0, 0, 1, 1], [], []>} : vector<32x32xf32>, vector<32x128xf32>, vector<32x128xf32> -> vector<32x128xf32>
    %74 = vector.broadcast %63 : vector<32x1xf32> to vector<32x128xf32>
    %75 = arith.addf %73, %74 : vector<32x128xf32>
    %cst_27 = arith.constant 0.000000e+00 : f32
    %76 = vector.broadcast %cst_27 : f32 to vector<32x128xf32>
    %77 = arith.maximumf %75, %76 : vector<32x128xf32>
    %78 = vector.broadcast %64 : vector<32x1xf32> to vector<32x128xf32>
    %79 = arith.mulf %77, %78 : vector<32x128xf32>
    %cst_28 = arith.constant dense<0.000000e+00> : vector<128xf32>
    %80 = vector.multi_reduction <add>, %79, %cst_28 [0] : vector<32x128xf32> to vector<128xf32>
    %81 = vector.shape_cast %80 : vector<128xf32> to vector<1x128xf32>
    %82 = vector.broadcast %65 : vector<1x1xf32> to vector<1x128xf32>
    %83 = arith.addf %81, %82 : vector<1x128xf32>
    %c0_29 = arith.constant 0 : index
    %c0_30 = arith.constant 0 : index
    %84 = vector.load %arg9[%c0_29, %c0_30] : memref<1x128xf32, #tpu.memory_space<vmem>>, vector<1x128xf32>
    tpu.vector_store %arg9[%c0_29, %c0_30], %83 {strides = array<i32>} : memref<1x128xf32, #tpu.memory_space<vmem>>, vector<1x128xf32>,
    return
  }
  func.func @transform_0(%arg0: i32) -> (i32, i32) {
    %c0_i32 = arith.constant 0 : i32
    %c0_i32_0 = arith.constant 0 : i32
    return %c0_i32, %arg0 : i32, i32
  }
  func.func @transform_1(%arg0: i32) -> (i32, i32) {
    %c0_i32 = arith.constant 0 : i32
    %c0_i32_0 = arith.constant 0 : i32
    return %c0_i32, %arg0 : i32, i32
  }
  func.func @transform_2(%arg0: i32) -> (i32, i32) {
    %c0_i32 = arith.constant 0 : i32
    %c0_i32_0 = arith.constant 0 : i32
    %c0_i32_1 = arith.constant 0 : i32
    return %c0_i32, %c0_i32_0 : i32, i32
  }
  func.func @transform_3(%arg0: i32) -> (i32, i32) {
    %c0_i32 = arith.constant 0 : i32
    %c0_i32_0 = arith.constant 0 : i32
    %c0_i32_1 = arith.constant 0 : i32
    return %c0_i32, %c0_i32_0 : i32, i32
  }
  func.func @transform_4(%arg0: i32) -> (i32, i32) {
    %c0_i32 = arith.constant 0 : i32
    %c0_i32_0 = arith.constant 0 : i32
    %c0_i32_1 = arith.constant 0 : i32
    return %c0_i32, %c0_i32_0 : i32, i32
  }
  func.func @transform_5(%arg0: i32) -> (i32, i32) {
    %c0_i32 = arith.constant 0 : i32
    %c0_i32_0 = arith.constant 0 : i32
    %c0_i32_1 = arith.constant 0 : i32
    return %c0_i32, %c0_i32_0 : i32, i32
  }
  func.func @transform_6(%arg0: i32) -> (i32, i32) {
    %c0_i32 = arith.constant 0 : i32
    %c0_i32_0 = arith.constant 0 : i32
    %c0_i32_1 = arith.constant 0 : i32
    return %c0_i32, %c0_i32_0 : i32, i32
  }
  func.func @transform_7(%arg0: i32) -> (i32, i32) {
    %c0_i32 = arith.constant 0 : i32
    %c0_i32_0 = arith.constant 0 : i32
    %c0_i32_1 = arith.constant 0 : i32
    return %c0_i32, %c0_i32_0 : i32, i32
  }
  func.func @transform_8(%arg0: i32) -> (i32, i32) {
    %c0_i32 = arith.constant 0 : i32
    %c0_i32_0 = arith.constant 0 : i32
    return %c0_i32, %arg0 : i32, i32
  }
}

</mosaic_0001>

<bundles_post_ra>
// kernel: kpnn_forward.1
= control target key start
LH: loop header
LB: loop body
LE: loop exit
PB: predicated region body
PF: predicated region fallthrough
CT: control target
= control target key end

     0   :  { %13 = vsyncpa [#allocation3], 0  ;;  %s2135_s0 = inlined_call_operand.vmem [shape: s32[4,128], index: 0, kind: input, shape index: {}]   ;;  %s2136_s1 = inlined_call_operand.vmem [shape: f32[4,128], index: 1, kind: input, shape index: {}]   ;;  %s2137_s2 = inlined_call_operand.hbm [shape: f32[8,128], index: 2, kind: input, shape index: {}]   ;;  %s2138_s3 = inlined_call_operand.vmem [shape: f32[48,48], index: 3, kind: input, shape index: {}]   ;;  %s2139_s4 = inlined_call_operand.vmem [shape: f32[32,32], index: 4, kind: input, shape index: {}]   ;;  %s2140_s5 = inlined_call_operand.hbm [shape: f32[32,48], index: 5, kind: input, shape index: {}]   ;;  %s2141_s6 = inlined_call_operand.vmem [shape: f32[32,32], index: 6, kind: input, shape index: {}]   ;;  %s2142_s7 = inlined_call_operand.vmem [shape: f32[32,8], index: 7, kind: input, shape index: {}]   ;;  %s2143_s8 = inlined_call_operand.vmem [shape: f32[1,128], index: 8, kind: output, shape index: {}]  }
   0x1   :  { %14 = vsyncpa [#allocation5], 0  ;;  %s1671_s27 = smov [#allocation2]   ;;  %s1672_s29 = smov [#allocation4]  }
   0x2   :  { %s25_s28 = sshll.u32 %s1671_s27, 4  ;;  %s38_s30 = sshll.u32 %s1672_s29, 4  ;;  %s26_s28 = int_to_ptr.vmem [resolvable:$true] %s25_s28  ;;  %s1727_s30 = int_to_ptr.vmem [resolvable:$true] %s38_s30 }
   0x3   :  { %s1623_s11 = scalar_lea.hbm %s2137_s2, 128 }
   0x4   :  { %p1624_p0 = scmp.ne.s32.totalorder %s2137_s2, %s1623_s11  ;;  %p1627_p1 = scmp.lt.u32.totalorder %s1623_s11, %s2137_s2 }
   0x6   :  { %p1629_p2 = pnand %p1627_p1, %p1624_p0 }
   0x8   :  { %1632 = shalt.err (!%p1629_p2)
}
   0x9   :  { %s1633_s16 = scalar_lea.vmem %s26_s28, 128  ;;  %p1638_p4 = scmp.lt.s32.totalorder %s26_s28, %s26_s28 }
   0xa   :  { %p1634_p3 = scmp.ne.s32.totalorder %s26_s28, %s1633_s16  ;;  %p1639_p5 = scmp.lt.s32.totalorder %s1633_s16, %s1633_s16 }
   0xc   :  { %p1640_p6 = por %p1639_p5, %p1638_p4 }
   0xe   :  { %p1641_p7 = pnand %p1640_p6, %p1634_p3 }
  0x10   :  { %1644 = shalt.err (!%p1641_p7)
}
  0x11   :  { %28 = dma.hbm_to_vmem [thread:$0]  %s2137_s2, 128, %s26_s28, [#allocation3]  }
  0x12   :  { %s1645_s21 = scalar_lea.hbm %s2140_s5, 512 }
  0x13   :  { %p1646_p8 = scmp.ne.s32.totalorder %s2140_s5, %s1645_s21  ;;  %p1649_p9 = scmp.lt.u32.totalorder %s1645_s21, %s2140_s5 }
  0x15   :  { %p1651_p10 = pnand %p1649_p9, %p1646_p8 }
  0x17   :  { %1654 = shalt.err (!%p1651_p10)
}
  0x18   :  { %s1655_s26 = scalar_lea.vmem %s1727_s30, 512  ;;  %p1660_p12 = scmp.lt.s32.totalorder %s1727_s30, %s1727_s30 }
  0x19   :  { %p1656_p11 = scmp.ne.s32.totalorder %s1727_s30, %s1655_s26  ;;  %p1661_p13 = scmp.lt.s32.totalorder %s1655_s26, %s1655_s26 }
  0x1b   :  { %p1662_p0 = por %p1661_p13, %p1660_p12 }
  0x1d   :  { %p1663_p1 = pnand %p1662_p0, %p1656_p11 }
  0x1f   :  { %1666 = shalt.err (!%p1663_p1)
}
  0x20   :  { %s1673_s2 = smov 128   ;;  %s1674_s27 = smov 8  }
  0x21   :  { %44 = dma.hbm_to_vmem [thread:$0]  %s2140_s5, 512, %s1727_s30, [#allocation5], %s1673_s2, %s1673_s2, %s1674_s27  }
  0x22   :  { %1667 = dma.done.wait [#allocation3], 128  }
  0x23   :  { %1668 = vsyncadd [#allocation3], 4294967168 }
  0x24   :  { %1669 = dma.done.wait [#allocation5], 512  }
  0x25   :  { %1670 = vsyncadd [#allocation5], 4294966784  ;;  %v80_v0 = vlaneseq  ;;  %v1675_v1 = vmov 0.0|0.0   ;;  %vm1676_vm0 = vmmov 0   ;;  %v1677_v3 = vmov 0.0   ;;  %v1946_v35 = vld [vmem:[#allocation2] sm:$0xff] }
  0x26   :  { %1433 = vmatprep.subr.bf16.mxu0 %v1675_v1  ;;  %1465 = vmatprep.subr.bf16.mxu1 %v1675_v1  ;;  %v1774_v7 = vld [vmem:[%s2135_s0] sm:$0xf]  ;;  %v59_v51 = vld [vmem:[%s2138_s3 + $0x8] sm:$0xff]  ;;  %v60_v52 = vld [vmem:[%s2138_s3 + $0x10] sm:$0xff]  ;;  %v1678_v59 = vmov 0  }
  0x27   :  { %v1760_v2 = vshrl.u32 %v80_v0, 7  ;;  %1258 = vmatprep.mubr.msk.f32.mxu0 %vm1676_vm0, %v1677_v3  ;;  %1293 = vmatprep.mubr.msk.f32.mxu1 %vm1676_vm0, %v1677_v3  ;;  %v1779_v8 = vld [vmem:[%s2136_s1] sm:$0xf]  ;;  %v61_v53 = vld [vmem:[%s2138_s3 + $0x18] sm:$0xff]  ;;  %v63_v55 = vld [vmem:[%s2138_s3 + $0x28] sm:$0xff] }
  0x28   :  { %v58_v38 = vld [vmem:[%s2138_s3] sm:$0xff]  ;;  %v68_v56 = vld [vmem:[#allocation4] sm:$0xff]  ;;  %v2082_v58 = vld [vmem:[%s2142_s7 + $0x10] sm:$0xff]  ;;  %1616 = vset.pattern.permute.xlu0 %v1678_v59  ;;  %1617 = vset.pattern.permute.xlu1 %v1678_v59 }
  0x29   :  { %v99_v4 = vsub.s32 0, %v1760_v2  ;;  %v209_v5 = vsub.s32 1, %v1760_v2  ;;  %v1769_v6 = vadd.s32 8, %v1760_v2  ;;  %v1782_v9 = vadd.s32 16, %v1760_v2  ;;  %v62_v54 = vld [vmem:[%s2138_s3 + $0x20] sm:$0xff]  ;;  %864 = vperm.xlu1 %1617, %v2082_v58   ;;  %v77_v60 = vld [vmem:[%s2142_s7 + $0x8] sm:$0xff] }
  0x2a   :  { %v1785_v10 = vadd.s32 24, %v1760_v2  ;;  %v1796_v15 = vadd.s32 32, %v1760_v2  ;;  %v1799_v16 = vadd.s32 40, %v1760_v2  ;;  %v1830_v19 = vadd.s32 48, %v1760_v2  ;;  %v2077_v57 = vld [vmem:[%s2142_s7] sm:$0xff]  ;;  %v79_v61 = vld [vmem:[%s2142_s7 + $0x18] sm:$0xff] }
  0x2b   :  { %v1788_v11 = vrot.slane %v1774_v7, %v99_v4  ;;  %v120_v12 = vrot.slane %v1779_v8, %v99_v4  ;;  %v1792_v13 = vrot.slane %v1774_v7, %v209_v5  ;;  %v230_v14 = vrot.slane %v1779_v8, %v209_v5  ;;  %854 = vperm.xlu0 %1616, %v2077_v57  }
  0x2c   :  { %v1833_v20 = vadd.s32 56, %v1760_v2  ;;  %v1848_v21 = vadd.s32 64, %v1760_v2  ;;  %v1851_v22 = vadd.s32 72, %v1760_v2  ;;  %v1866_v23 = vadd.s32 80, %v1760_v2 }
  0x2d   :  { %vm101_vm1 = vcmp.eq.s32.totalorder %v1760_v2, %v1788_v11  ;;  %vm102_vm2 = vcmp.eq.s32.totalorder %v1769_v6, %v1788_v11  ;;  %v1805_v17 = vpack.c.bf16 %v120_v12, %v120_v12  ;;  %vm211_vm3 = vcmp.eq.s32.totalorder %v1760_v2, %v1792_v13  ;;  %869 = vperm.xlu1 %1617, %v79_v61  }
  0x2e   :  { %vm1435_vm4 = vmpackc.low %vm102_vm2, %vm101_vm1  ;;  %vm212_vm5 = vcmp.eq.s32.totalorder %v1769_v6, %v1792_v13  ;;  %v1811_v18 = vpack.c.bf16 %v230_v14, %v230_v14  ;;  %vm103_vm6 = vcmp.eq.s32.totalorder %v1782_v9, %v1788_v11  ;;  %vm104_vm7 = vcmp.eq.s32.totalorder %v1785_v10, %v1788_v11  ;;  %v70_v14 = vld [vmem:[#allocation4 + $0x10] sm:$0xff] }
  0x2f   :  { %1436 = vmatpush3.bf16.msk.msra.mxu0 %vm1435_vm4, %v1805_v17  ;;  %vm1467_vm8 = vmpackc.low %vm212_vm5, %vm211_vm3  ;;  %vm213_vm9 = vcmp.eq.s32.totalorder %v1782_v9, %v1792_v13  ;;  %vm214_vm10 = vcmp.eq.s32.totalorder %v1785_v10, %v1792_v13  ;;  %vm105_vm13 = vcmp.eq.s32.totalorder %v1796_v15, %v1788_v11  ;;  %vm106_vm14 = vcmp.eq.s32.totalorder %v1799_v16, %v1788_v11 }
  0x30   :  { %1468 = vmatpush3.bf16.msk.msra.mxu1 %vm1467_vm8, %v1811_v18  ;;  %1437 = vmatprep.subr.bf16.mxu0 %v1675_v1  ;;  %vm1439_vm11 = vmpackc.low %vm104_vm7, %vm103_vm6  ;;  %vm215_vm15 = vcmp.eq.s32.totalorder %v1796_v15, %v1792_v13  ;;  %vm216_vm1 = vcmp.eq.s32.totalorder %v1799_v16, %v1792_v13  ;;  %vm107_vm4 = vcmp.eq.s32.totalorder %v1830_v19, %v1788_v11  ;;  %v1869_v24 = vadd.s32 88, %v1760_v2 }
  0x31   :  { %1469 = vmatprep.subr.bf16.mxu1 %v1675_v1  ;;  %vm1471_vm12 = vmpackc.low %vm214_vm10, %vm213_vm9  ;;  %vm108_vm5 = vcmp.eq.s32.totalorder %v1833_v20, %v1788_v11  ;;  %vm217_vm6 = vcmp.eq.s32.totalorder %v1830_v19, %v1792_v13  ;;  %vm218_vm7 = vcmp.eq.s32.totalorder %v1833_v20, %v1792_v13  ;;  %vm109_vm10 = vcmp.eq.s32.totalorder %v1848_v21, %v1788_v11 }
  0x32   :  { %vm1443_vm2 = vmpackc.low %vm106_vm14, %vm105_vm13  ;;  %vm220_vm13 = vcmp.eq.s32.totalorder %v1851_v22, %v1792_v13  ;;  %v1884_v25 = vadd.s32 96, %v1760_v2  ;;  %v1887_v26 = vadd.s32 104, %v1760_v2  ;;  %v1897_v27 = vadd.s32 112, %v1760_v2  ;;  %859 = vperm.xlu0 %1616, %v77_v60  }
  0x33   :  { %1440 = vmatpush3.bf16.msk.msra.mxu0 %vm1439_vm11, %v1805_v17  ;;  %vm1475_vm3 = vmpackc.low %vm216_vm1, %vm215_vm15  ;;  %vm110_vm11 = vcmp.eq.s32.totalorder %v1851_v22, %v1788_v11  ;;  %vm111_vm1 = vcmp.eq.s32.totalorder %v1866_v23, %v1788_v11  ;;  %v1905_v28 = vadd.s32 120, %v1760_v2  ;;  %v319_v29 = vsub.s32 2, %v1760_v2 }
  0x34   :  { %1472 = vmatpush3.bf16.msk.msra.mxu1 %vm1471_vm12, %v1811_v18  ;;  %1441 = vmatprep.subr.bf16.mxu0 %v1675_v1  ;;  %vm1447_vm8 = vmpackc.low %vm108_vm5, %vm107_vm4  ;;  %vm219_vm12 = vcmp.eq.s32.totalorder %v1848_v21, %v1792_v13  ;;  %vm222_vm4 = vcmp.eq.s32.totalorder %v1869_v24, %v1792_v13  ;;  %v429_v30 = vsub.s32 3, %v1760_v2 }
  0x35   :  { %1473 = vmatprep.subr.bf16.mxu1 %v1675_v1  ;;  %vm1479_vm9 = vmpackc.low %vm218_vm7, %vm217_vm6  ;;  %vm113_vm7 = vcmp.eq.s32.totalorder %v1884_v25, %v1788_v11  ;;  %v1922_v31 = vrot.slane %v1774_v7, %v319_v29  ;;  %v340_v33 = vrot.slane %v1779_v8, %v319_v29 }
  0x36   :  { %vm1451_vm14 = vmpackc.low %vm110_vm11, %vm109_vm10  ;;  %vm224_vm10 = vcmp.eq.s32.totalorder %v1887_v26, %v1792_v13  ;;  %v1929_v32 = vrot.slane %v1774_v7, %v429_v30  ;;  %v450_v34 = vrot.slane %v1779_v8, %v429_v30 }
  0x37   :  { %1444 = vmatpush3.bf16.msk.msra.mxu0 %vm1443_vm2, %v1805_v17  ;;  %vm1483_vm15 = vmpackc.low %vm220_vm13, %vm219_vm12  ;;  %vm112_vm2 = vcmp.eq.s32.totalorder %v1869_v24, %v1788_v11  ;;  %vm115_vm13 = vcmp.eq.s32.totalorder %v1897_v27, %v1788_v11  ;;  %v1948_v36 = vpack.c.bf16 %v340_v33, %v340_v33 }
  0x38   :  { %1476 = vmatpush3.bf16.msk.msra.mxu1 %vm1475_vm3, %v1811_v18  ;;  %1445 = vmatprep.subr.bf16.mxu0 %v1675_v1  ;;  %vm221_vm3 = vcmp.eq.s32.totalorder %v1866_v23, %v1792_v13  ;;  %vm1455_vm5 = vmpackc.low %vm112_vm2, %vm111_vm1  ;;  %vm226_vm1 = vcmp.eq.s32.totalorder %v1905_v28, %v1792_v13  ;;  %v1952_v37 = vpack.c.bf16 %v450_v34, %v450_v34 }
  0x39   :  { %1477 = vmatprep.subr.bf16.mxu1 %v1675_v1  ;;  %vm1487_vm6 = vmpackc.low %vm222_vm4, %vm221_vm3  ;;  %vm321_vm4 = vcmp.eq.s32.totalorder %v1760_v2, %v1922_v31 }
  0x3b   :  { %1448 = vmatpush3.bf16.msk.msra.mxu0 %vm1447_vm8, %v1805_v17  ;;  %vm114_vm8 = vcmp.eq.s32.totalorder %v1887_v26, %v1788_v11 }
  0x3c   :  { %1480 = vmatpush3.bf16.msk.msra.mxu1 %vm1479_vm9, %v1811_v18  ;;  %1449 = vmatprep.subr.bf16.mxu0 %v1675_v1  ;;  %vm223_vm9 = vcmp.eq.s32.totalorder %v1884_v25, %v1792_v13  ;;  %vm1459_vm11 = vmpackc.low %vm114_vm8, %vm113_vm7  ;;  %vm432_vm7 = vcmp.eq.s32.totalorder %v1769_v6, %v1929_v32 }
  0x3d   :  { %1481 = vmatprep.subr.bf16.mxu1 %v1675_v1  ;;  %vm1491_vm12 = vmpackc.low %vm224_vm10, %vm223_vm9  ;;  %vm323_vm10 = vcmp.eq.s32.totalorder %v1782_v9, %v1922_v31 }
  0x3f   :  { %1452 = vmatpush3.bf16.msk.msra.mxu0 %vm1451_vm14, %v1805_v17  ;;  %vm116_vm14 = vcmp.eq.s32.totalorder %v1905_v28, %v1788_v11 }
  0x40   :  { %1484 = vmatpush3.bf16.msk.msra.mxu1 %vm1483_vm15, %v1811_v18  ;;  %1453 = vmatprep.subr.bf16.mxu0 %v1675_v1  ;;  %vm225_vm15 = vcmp.eq.s32.totalorder %v1897_v27, %v1792_v13  ;;  %vm1463_vm2 = vmpackc.low %vm116_vm14, %vm115_vm13  ;;  %vm434_vm13 = vcmp.eq.s32.totalorder %v1785_v10, %v1929_v32  ;;  %v69_v13 = vld [vmem:[#allocation4 + $0x8] sm:$0xff] }
  0x41   :  { %1485 = vmatprep.subr.bf16.mxu1 %v1675_v1  ;;  %vm1495_vm3 = vmpackc.low %vm226_vm1, %vm225_vm15  ;;  %vm325_vm1 = vcmp.eq.s32.totalorder %v1796_v15, %v1922_v31 }
  0x43   :  { %1456 = vmatpush3.bf16.msk.msra.mxu0 %vm1455_vm5, %v1805_v17  ;;  %vm322_vm5 = vcmp.eq.s32.totalorder %v1769_v6, %v1922_v31 }
  0x44   :  { %1488 = vmatpush3.bf16.msk.msra.mxu1 %vm1487_vm6, %v1811_v18  ;;  %1457 = vmatprep.subr.bf16.mxu0 %v1675_v1  ;;  %vm431_vm6 = vcmp.eq.s32.totalorder %v1760_v2, %v1929_v32  ;;  %vm1499_vm8 = vmpackc.low %vm322_vm5, %vm321_vm4  ;;  %vm436_vm4 = vcmp.eq.s32.totalorder %v1799_v16, %v1929_v32 }
  0x45   :  { %1489 = vmatprep.subr.bf16.mxu1 %v1675_v1  ;;  %vm1531_vm9 = vmpackc.low %vm432_vm7, %vm431_vm6  ;;  %vm327_vm7 = vcmp.eq.s32.totalorder %v1830_v19, %v1922_v31 }
  0x47   :  { %1460 = vmatpush3.bf16.msk.msra.mxu0 %vm1459_vm11, %v1805_v17  ;;  %vm324_vm11 = vcmp.eq.s32.totalorder %v1785_v10, %v1922_v31 }
  0x48   :  { %1492 = vmatpush3.bf16.msk.msra.mxu1 %vm1491_vm12, %v1811_v18  ;;  %1461 = vmatprep.subr.bf16.mxu0 %v1675_v1  ;;  %vm433_vm12 = vcmp.eq.s32.totalorder %v1782_v9, %v1929_v32  ;;  %vm1503_vm14 = vmpackc.low %vm324_vm11, %vm323_vm10 }
  0x49   :  { %1493 = vmatprep.subr.bf16.mxu1 %v1675_v1  ;;  %vm1535_vm15 = vmpackc.low %vm434_vm13, %vm433_vm12  ;;  %vm329_vm12 = vcmp.eq.s32.totalorder %v1848_v21, %v1922_v31  ;;  %vm330_vm13 = vcmp.eq.s32.totalorder %v1851_v22, %v1922_v31 }
  0x4b   :  { %1464 = vmatpush3.bf16.msk.msra.mxu0 %vm1463_vm2, %v1805_v17  ;;  %vm326_vm2 = vcmp.eq.s32.totalorder %v1799_v16, %v1922_v31  ;;  %v64_v16 = vld [vmem:[%s2139_s4] sm:$0xff]  ;;  %v65_v17 = vld [vmem:[%s2139_s4 + $0x8] sm:$0xff] }
  0x4c   :  { %1496 = vmatpush3.bf16.msk.msra.mxu1 %vm1495_vm3, %v1811_v18  ;;  %1497 = vmatprep.subr.bf16.mxu0 %v1675_v1  ;;  %vm435_vm3 = vcmp.eq.s32.totalorder %v1796_v15, %v1929_v32  ;;  %vm1507_vm5 = vmpackc.low %vm326_vm2, %vm325_vm1  ;;  %v71_v15 = vld [vmem:[#allocation4 + $0x18] sm:$0xff]  ;;  %v66_v18 = vld [vmem:[%s2139_s4 + $0x10] sm:$0xff] }
  0x4d   :  { %1529 = vmatprep.subr.bf16.mxu1 %v1675_v1  ;;  %vm1539_vm6 = vmpackc.low %vm436_vm4, %vm435_vm3  ;;  %vm331_vm3 = vcmp.eq.s32.totalorder %v1866_v23, %v1922_v31  ;;  %vm332_vm4 = vcmp.eq.s32.totalorder %v1869_v24, %v1922_v31 }
  0x4e   :  { %1259 = vmatmul.mubr.f32.vlgmr.msra.gmra.mrb[0].mxu0 %v1946_v35  ;;  %vm1515_vm1 = vmpackc.low %vm330_vm13, %vm329_vm12 }
  0x4f   :  { %1294 = vmatmul.mubr.f32.vlgmr.msra.gmra.mrb[0].mxu1 %v1946_v35  ;;  %1500 = vmatpush3.bf16.msk.msra.mxu0 %vm1499_vm8, %v1948_v36  ;;  %vm328_vm8 = vcmp.eq.s32.totalorder %v1833_v20, %v1922_v31 }
  0x50   :  { %1532 = vmatpush3.bf16.msk.msra.mxu1 %vm1531_vm9, %v1952_v37  ;;  %1501 = vmatprep.subr.bf16.mxu0 %v1675_v1  ;;  %vm437_vm9 = vcmp.eq.s32.totalorder %v1830_v19, %v1929_v32  ;;  %vm1511_vm10 = vmpackc.low %vm328_vm8, %vm327_vm7  ;;  %v67_v19 = vld [vmem:[%s2139_s4 + $0x18] sm:$0xff] }
  0x51   :  { %1533 = vmatprep.subr.bf16.mxu1 %v1675_v1  ;;  %1328 = vmatprep.mubr.msk.f32.mxu0 %vm1676_vm0, %v1677_v3  ;;  %vm1519_vm7 = vmpackc.low %vm332_vm4, %vm331_vm3 }
  0x52   :  { %1363 = vmatprep.mubr.msk.f32.mxu1 %vm1676_vm0, %v1677_v3  ;;  %vm438_vm0 = vcmp.eq.s32.totalorder %v1833_v20, %v1929_v32  ;;  %v72_v20 = vld [vmem:[%s2141_s6] sm:$0xff] }
  0x53   :  { %1504 = vmatpush3.bf16.msk.msra.mxu0 %vm1503_vm14, %v1948_v36  ;;  %vm1543_vm11 = vmpackc.low %vm438_vm0, %vm437_vm9  ;;  %vm439_vm14 = vcmp.eq.s32.totalorder %v1848_v21, %v1929_v32  ;;  %vm333_vm9 = vcmp.eq.s32.totalorder %v1884_v25, %v1922_v31  ;;  %vm334_vm0 = vcmp.eq.s32.totalorder %v1887_v26, %v1922_v31  ;;  %v1679_v21 = vmov 1  }
  0x54   :  { %1536 = vmatpush3.bf16.msk.msra.mxu1 %vm1535_vm15, %v1952_v37  ;;  %1505 = vmatprep.subr.bf16.mxu0 %v1675_v1  ;;  %vm440_vm15 = vcmp.eq.s32.totalorder %v1851_v22, %v1929_v32  ;;  %vm1523_vm12 = vmpackc.low %vm334_vm0, %vm333_vm9  ;;  %v1680_v22 = vmov 2  }
  0x55   :  { %1537 = vmatprep.subr.bf16.mxu1 %v1675_v1  ;;  %vm1547_vm2 = vmpackc.low %vm440_vm15, %vm439_vm14  ;;  %vm335_vm14 = vcmp.eq.s32.totalorder %v1897_v27, %v1922_v31  ;;  %vm336_vm15 = vcmp.eq.s32.totalorder %v1905_v28, %v1922_v31  ;;  %1619 = vset.pattern.permute.xlu1 %v1679_v21 }
  0x56   :  { %vm1527_vm3 = vmpackc.low %vm336_vm15, %vm335_vm14  ;;  %1618 = vset.pattern.permute.xlu0 %v1679_v21  ;;  %885 = vperm.xlu1 %1619, %v77_v60  }
  0x57   :  { %1508 = vmatpush3.bf16.msk.msra.mxu0 %vm1507_vm5, %v1948_v36  ;;  %vm441_vm5 = vcmp.eq.s32.totalorder %v1866_v23, %v1929_v32  ;;  %881 = vperm.xlu0 %1618, %v2077_v57   ;;  %v1681_v23 = vmov 3  }
  0x58   :  { %1540 = vmatpush3.bf16.msk.msra.mxu1 %vm1539_vm6, %v1952_v37  ;;  %1509 = vmatprep.subr.bf16.mxu0 %v1675_v1  ;;  %vm442_vm6 = vcmp.eq.s32.totalorder %v1869_v24, %v1929_v32 }
  0x59   :  { %1541 = vmatprep.subr.bf16.mxu1 %v1675_v1  ;;  %vm1551_vm8 = vmpackc.low %vm442_vm6, %vm441_vm5  ;;  %vm537_vm5 = vcmask 392192   ;;  %vm754_vm6 = vcmask 261120  }
  0x5a   :  { %889 = vperm.xlu1 %1619, %v2082_v58  }
  0x5b   :  { %1512 = vmatpush3.bf16.msk.msra.mxu0 %vm1511_vm10, %v1948_v36  ;;  %vm443_vm10 = vcmp.eq.s32.totalorder %v1884_v25, %v1929_v32  ;;  %893 = vperm.xlu0 %1618, %v79_v61  }
  0x5c   :  { %1544 = vmatpush3.bf16.msk.msra.mxu1 %vm1543_vm11, %v1952_v37  ;;  %1513 = vmatprep.subr.bf16.mxu0 %v1675_v1  ;;  %vm444_vm11 = vcmp.eq.s32.totalorder %v1887_v26, %v1929_v32 }
  0x5d   :  { %1545 = vmatprep.subr.bf16.mxu1 %v1675_v1  ;;  %vm1555_vm13 = vmpackc.low %vm444_vm11, %vm443_vm10 }
  0x5e   :  { %1620 = vset.pattern.permute.xlu1 %v1680_v22 }
  0x5f   :  { %1516 = vmatpush3.bf16.msk.msra.mxu0 %vm1515_vm1, %v1948_v36  ;;  %vm445_vm1 = vcmp.eq.s32.totalorder %v1897_v27, %v1929_v32  ;;  %1621 = vset.pattern.permute.xlu0 %v1680_v22 }
  0x60   :  { %1548 = vmatpush3.bf16.msk.msra.mxu1 %vm1547_vm2, %v1952_v37  ;;  %1517 = vmatprep.subr.bf16.mxu0 %v1675_v1  ;;  %vm446_vm2 = vcmp.eq.s32.totalorder %v1905_v28, %v1929_v32 }
  0x61   :  { %1549 = vmatprep.subr.bf16.mxu1 %v1675_v1  ;;  %vm1559_vm4 = vmpackc.low %vm446_vm2, %vm445_vm1  ;;  %998 = vperm.xlu1 %1620, %v2077_v57  }
  0x62   :  { %1002 = vperm.xlu0 %1621, %v77_v60  }
  0x63   :  { %1520 = vmatpush3.bf16.msk.msra.mxu0 %vm1519_vm7, %v1948_v36 }
  0x64   :  { %1552 = vmatpush3.bf16.msk.msra.mxu1 %vm1551_vm8, %v1952_v37  ;;  %1521 = vmatprep.subr.bf16.mxu0 %v1675_v1 }
  0x65   :  { %1553 = vmatprep.subr.bf16.mxu1 %v1675_v1  ;;  %1006 = vperm.xlu1 %1620, %v2082_v58  }
  0x66   :  { %1622 = vset.pattern.permute.xlu0 %v1681_v23 }
  0x67   :  { %1524 = vmatpush3.bf16.msk.msra.mxu0 %vm1523_vm12, %v1948_v36  ;;  %1027 = vperm.xlu0 %1622, %v2077_v57  }
  0x68   :  { %1556 = vmatpush3.bf16.msk.msra.mxu1 %vm1555_vm13, %v1952_v37  ;;  %1525 = vmatprep.subr.bf16.mxu0 %v1675_v1 }
  0x69   :  { %1557 = vmatprep.subr.bf16.mxu1 %v1675_v1  ;;  %1010 = vperm.xlu1 %1620, %v79_v61  }
  0x6b   :  { %1528 = vmatpush3.bf16.msk.msra.mxu0 %vm1527_vm3, %v1948_v36 }
  0x6c   :  { %1560 = vmatpush3.bf16.msk.msra.mxu1 %vm1559_vm4, %v1952_v37 }
  0x6e   :  { %1329 = vmatmul.mubr.f32.vlgmr.msra.gmra.mrb[2].mxu0 %v1946_v35 }
  0x6f   :  { %1364 = vmatmul.mubr.f32.vlgmr.msra.gmra.mrb[2].mxu1 %v1946_v35  ;;  %1378 = vmatprep.mubr.msk.f32.mxu0 %vm537_vm5, %v58_v38 }
  0x70   :  { %1399 = vmatprep.mubr.msk.f32.mxu1 %vm537_vm5, %v68_v56 }
  0xa8   :  { %v865_v25 = vpop.permute.xlu1 %864 }
  0xaa   :  { %v855_v24 = vpop.permute.xlu0 %854 }
  0xac   :  { %v870_v33 = vpop.permute.xlu1 %869 }
  0xb1   :  { %v860_v26 = vpop.permute.xlu0 %859 }
 0x121   :  { %v203_v39 = vpop.f32.mrb[0].mxu0 }
 0x122   :  { %v1561_v40 = vpack.c.bf16 %v203_v39, %v203_v39  ;;  %v1260_v41 = vpop.f32.mrb[1].mxu0  ;;  %v313_v42 = vpop.f32.mrb[0].mxu1 }
 0x123   :  { %v1565_v43 = vpack.c.bf16 %v313_v42, %v203_v39  ;;  %v1295_v44 = vpop.f32.mrb[1].mxu1 }
 0x124   :  { %1562 = vmatprep.subr.bf16.mxu0 %v1561_v40  ;;  %v75_v44 = vld [vmem:[%s2141_s6 + $0x18] sm:$0xff] }
 0x125   :  { %1564 = vmatpush3.bf16.msra.mxu0 %v1561_v40 }
 0x126   :  { %1566 = vmatprep.subr.bf16.mxu0 %v1565_v43 }
 0x129   :  { %1568 = vmatpush3.bf16.msra.mxu0 %v1565_v43 }
 0x141   :  { %v423_v45 = vpop.f32.mrb[2].mxu0 }
 0x142   :  { %v533_v46 = vpop.f32.mrb[2].mxu1  ;;  %v1330_v47 = vpop.f32.mrb[3].mxu0  ;;  %v1569_v48 = vpack.c.bf16 %v423_v45, %v313_v42 }
 0x143   :  { %v1365_v49 = vpop.f32.mrb[3].mxu1  ;;  %v1589_v50 = vpack.c.bf16 %v533_v46, %v423_v45 }
 0x144   :  { %1570 = vmatprep.subr.bf16.mxu0 %v1569_v48 }
 0x145   :  { %1572 = vmatpush3.bf16.msra.mxu0 %v1569_v48 }
 0x148   :  { %1379 = vmatmul.mubr.msk.f32.vlgmr.msra.gmra.mrb[4].mxu0 %vm537_vm5, %v59_v51 }
 0x149   :  { %1381 = vmatprep.mubr.msk.f32.mxu0 %vm537_vm5, %v60_v52 }
 0x14c   :  { %1382 = vmatmul.mubr.msk.f32.gmra.mrb[6].mxu0 %vm537_vm5, %v61_v53 }
 0x14d   :  { %1384 = vmatprep.mubr.msk.f32.mxu0 %vm537_vm5, %v62_v54 }
 0x150   :  { %1385 = vmatmul.mubr.msk.f32.gmra.mrb[8].mxu0 %vm537_vm5, %v63_v55 }
 0x151   :  { %1427 = vmatprep.mubr.msk.f32.mxu0 %vm754_vm6, %v72_v20 }
 0x21b   :  { %v1380_v62 = vpop.f32.mrb[4].mxu0 }
 0x21c   :  { %v652_v63 = vmul.f32 %v1380_v62, %v423_v45  ;;  %v622_v0 = vpop.f32.mrb[5].mxu0 }
 0x21d   :  { %v651_v1 = vmul.f32 %v622_v0, %v313_v42  ;;  %v73_v42 = vld [vmem:[%s2141_s6 + $0x8] sm:$0xff] }
 0x21f   :  { %v1573_v2 = vpack.c.bf16 %v652_v63, %v651_v1  ;;  %v1383_v3 = vpop.f32.mrb[6].mxu0 }
 0x220   :  { %v654_v4 = vmul.f32 %v1383_v3, %v423_v45  ;;  %v632_v5 = vpop.f32.mrb[7].mxu0  ;;  %v886_v45 = vpop.permute.xlu1 %885 }
 0x221   :  { %v653_v6 = vmul.f32 %v632_v5, %v533_v46  ;;  %1574 = vmatprep.subr.bf16.mxu1 %v1573_v2 }
 0x222   :  { %1576 = vmatpush3.bf16.msra.mxu1 %v1573_v2 }
 0x223   :  { %v1577_v7 = vpack.c.bf16 %v654_v4, %v653_v6  ;;  %v1386_v8 = vpop.f32.mrb[8].mxu0 }
 0x224   :  { %v656_v9 = vmul.f32 %v1386_v8, %v533_v46  ;;  %v642_v10 = vpop.f32.mrb[9].mxu0  ;;  %v890_v47 = vpop.permute.xlu1 %889 }
 0x225   :  { %v655_v11 = vmul.f32 %v642_v10, %v533_v46  ;;  %1578 = vmatprep.subr.bf16.mxu1 %v1577_v7  ;;  %v882_v46 = vpop.permute.xlu0 %881 }
 0x226   :  { %1580 = vmatpush3.bf16.msra.mxu1 %v1577_v7 }
 0x227   :  { %v1581_v12 = vpack.c.bf16 %v656_v9, %v655_v11 }
 0x228   :  { %v999_v49 = vpop.permute.xlu1 %998 }
 0x229   :  { %1582 = vmatprep.subr.bf16.mxu1 %v1581_v12  ;;  %v894_v48 = vpop.permute.xlu0 %893 }
 0x22a   :  { %1584 = vmatpush3.bf16.msra.mxu1 %v1581_v12 }
 0x22b   :  { %1586 = vmatprep.subr.bf16.mxu1 %v1565_v43 }
 0x22c   :  { %v1007_v58 = vpop.permute.xlu1 %1006 }
 0x22d   :  { %1400 = vmatmul.mubr.msk.f32.vlgmr.msra.gmra.mrb[4].mxu1 %vm537_vm5, %v69_v13  ;;  %v1003_v54 = vpop.permute.xlu0 %1002 }
 0x22e   :  { %1588 = vmatpush3.bf16.msra.mxu1 %v1565_v43  ;;  %1402 = vmatprep.mubr.msk.f32.mxu1 %vm537_vm5, %v70_v14  ;;  %v74_v43 = vld [vmem:[%s2141_s6 + $0x10] sm:$0xff] }
 0x22f   :  { %1590 = vmatprep.subr.bf16.mxu1 %v1589_v50 }
 0x230   :  { %v1011_v4 = vpop.permute.xlu1 %1010 }
 0x231   :  { %1403 = vmatmul.mubr.msk.f32.gmra.mrb[6].mxu1 %vm537_vm5, %v71_v15  ;;  %v1028_v13 = vpop.permute.xlu0 %1027 }
 0x232   :  { %1592 = vmatpush3.bf16.msra.mxu1 %v1589_v50  ;;  %1413 = vmatprep.mubr.msk.f32.mxu1 %vm754_vm6, %v64_v16 }
 0x235   :  { %1414 = vmatmul.mubr.msk.f32.vlgmr.msra.gmra.mrb[4].mxu1 %vm754_vm6, %v65_v17 }
 0x236   :  { %1416 = vmatprep.mubr.msk.f32.mxu1 %vm754_vm6, %v66_v18 }
 0x239   :  { %1417 = vmatmul.mubr.msk.f32.gmra.mrb[6].mxu1 %vm754_vm6, %v67_v19 }
 0x308   :  { %v1415_v27 = vpop.f32.mrb[4].mxu1 }
 0x309   :  { %v873_v28 = vadd.f32 %v1415_v27, %v860_v26  ;;  %v833_v29 = vpop.f32.mrb[5].mxu1 }
 0x30a   :  { %v872_v30 = vadd.f32 %v855_v24, %v833_v29 }
 0x30b   :  { %v877_v31 = vmax.f32 %v873_v28, 0.0 }
 0x30c   :  { %v876_v32 = vmax.f32 %v872_v30, 0.0  ;;  %v1418_v34 = vpop.f32.mrb[6].mxu1 }
 0x30d   :  { %v875_v35 = vadd.f32 %v1418_v34, %v870_v33  ;;  %v843_v36 = vpop.f32.mrb[7].mxu1 }
 0x30e   :  { %v1593_v37 = vpack.c.bf16 %v877_v31, %v876_v32  ;;  %v874_v38 = vadd.f32 %v865_v25, %v843_v36 }
 0x30f   :  { %v879_v39 = vmax.f32 %v875_v35, 0.0 }
 0x310   :  { %v878_v40 = vmax.f32 %v874_v38, 0.0  ;;  %1594 = vmatprep.subr.bf16.mxu0 %v1593_v37 }
 0x311   :  { %1596 = vmatpush3.bf16.msra.mxu0 %v1593_v37 }
 0x312   :  { %v1597_v41 = vpack.c.bf16 %v879_v39, %v878_v40 }
 0x314   :  { %1598 = vmatprep.subr.bf16.mxu0 %v1597_v41 }
 0x315   :  { %1600 = vmatpush3.bf16.msra.mxu0 %v1597_v41 }
 0x318   :  { %1428 = vmatmul.mubr.msk.f32.vlgmr.msra.gmra.mrb[10].mxu0 %vm754_vm6, %v73_v42 }
 0x319   :  { %1430 = vmatprep.mubr.msk.f32.mxu0 %vm754_vm6, %v74_v43 }
 0x31c   :  { %1431 = vmatmul.mubr.msk.f32.gmra.mrb[12].mxu0 %vm754_vm6, %v75_v44 }
 0x3eb   :  { %v1429_v50 = vpop.f32.mrb[10].mxu0 }
 0x3ec   :  { %v980_v51 = vadd.f32 %v1429_v50, %v886_v45  ;;  %v974_v52 = vpop.f32.mrb[11].mxu0 }
 0x3ed   :  { %v975_v53 = vadd.f32 %v974_v52, %v882_v46 }
 0x3ee   :  { %v994_v55 = vmax.f32 %v980_v51, 0.0 }
 0x3ef   :  { %v993_v56 = vmax.f32 %v975_v53, 0.0  ;;  %v1432_v57 = vpop.f32.mrb[12].mxu0 }
 0x3f0   :  { %v1014_v59 = vmul.f32 %v1003_v54, %v994_v55  ;;  %v990_v60 = vadd.f32 %v1432_v57, %v894_v48  ;;  %v984_v61 = vpop.f32.mrb[13].mxu0 }
 0x3f1   :  { %v1013_v62 = vmul.f32 %v999_v49, %v993_v56  ;;  %v985_v63 = vadd.f32 %v984_v61, %v890_v47 }
 0x3f2   :  { %v996_v1 = vmax.f32 %v990_v60, 0.0 }
 0x3f3   :  { %v1017_v0 = vadd.f32 %v1014_v59, %v1013_v62  ;;  %v995_v2 = vmax.f32 %v985_v63, 0.0 }
 0x3f4   :  { %v1016_v5 = vmul.f32 %v1011_v4, %v996_v1 }
 0x3f5   :  { %v1015_v3 = vmul.f32 %v1007_v58, %v995_v2 }
 0x3f7   :  { %v1018_v6 = vadd.f32 %v1017_v0, %v1015_v3 }
 0x3f9   :  { %v1019_v7 = vadd.f32 %v1018_v6, %v1016_v5 }
 0x3fb   :  { %v1020_v8 = vrot.slane %v1019_v7, 4 }
 0x3fd   :  { %v1021_v9 = vadd.f32 %v1020_v8, %v1019_v7 }
 0x3ff   :  { %v1022_v10 = vrot.slane %v1021_v9, 2 }
 0x401   :  { %v1023_v11 = vadd.f32 %v1022_v10, %v1021_v9 }
 0x403   :  { %v1024_v12 = vrot.slane %v1023_v11, 1 }
 0x405   :  { %v1025_v14 = vadd.f32 %v1024_v12, %v1023_v11 }
 0x407   :  { %v1030_v15 = vadd.f32 %v1028_v13, %v1025_v14 }
 0x409   :  { %1031 = vst [vmem:[%s2143_s8] sm:$0x1] %v1030_v15 }
 0x40a   :  { %1036 = vsyncpa [#allocation3], 1 }
 0x40b   :  { %1037 = vsyncpa [#allocation5], 1 }

</bundles_post_ra>
